<compile_context>
chip_gen: v6e
topology: v6e:2x2x1
jax: 0.10.0
libtpu: 0.0.40
codegen_flags: <defaults>
</compile_context>

<pallas_src>
import functools

import jax
import jax.numpy as jnp
from jax import lax
from jax.experimental import pallas as pl
from jax.experimental.pallas import tpu as pltpu

# ---------------- configuration (scaled-down, consistent) ----------------
D_MODEL = 128          # d_model == embed == filter_map
HIDDEN = 64            # LSTM hidden (bidirectional -> 2*HIDDEN == D_MODEL)
NUM_KERNELS = 128      # conv channels
BLOCKS = 2             # dpcnn blocks (convs has BLOCKS+1 entries)
OUT_DIMS = 3
KERNEL_SIZE = 3
RESOLUTION = 2000
VOCAB = 100

assert D_MODEL == 2 * HIDDEN == NUM_KERNELS


# ---------------- Pallas kernel: fused DPCNN conv stack ----------------
def _conv1d_same(x, w_flat, b):
    """Conv1d(kernel=3, padding=1) as a single im2col MXU matmul.

    x:      (BB, T, Cin) f32
    w_flat: (3*Cin, Cout) bf16, rows ordered [w_k-1 ; w_k0 ; w_k+1]
    b:      (1, Cout) f32
    returns (BB, T, Cout) f32
    y[t] = b + x[t-1] @ w[0] + x[t] @ w[1] + x[t+1] @ w[2]   (zero padded)
    """
    BB, T, Cin = x.shape
    Cout = w_flat.shape[-1]
    zrow = jnp.zeros((BB, 1, Cin), x.dtype)
    x_prev = jnp.concatenate([zrow, x[:, :-1, :]], axis=1)   # x[t-1], zero at t=0
    x_next = jnp.concatenate([x[:, 1:, :], zrow], axis=1)    # x[t+1], zero at t=T-1
    xcat = jnp.concatenate([x_prev, x, x_next], axis=-1).astype(jnp.bfloat16)
    y = jnp.dot(xcat.reshape(BB * T, KERNEL_SIZE * Cin), w_flat,
                preferred_element_type=jnp.float32)
    return y.reshape(BB, T, Cout) + b


def _conv_stack_kernel(x_ref, cw_ref, cb_ref, w_ref, b_ref, o_ref):
    """convert_conv + (BLOCKS+1) residual (ReLU-Conv-ReLU-Conv) blocks, fused.

    x_ref:  (BB, T, Cin)              f32   activations for this grid step
    cw_ref: (3*Cin, Ck)               bf16  convert_conv weight (im2col layout)
    cb_ref: (1, Ck)                   f32
    w_ref:  (BLOCKS+1, 2, 3*Ck, Ck)   bf16  block conv weights
    b_ref:  (BLOCKS+1, 2, 1, Ck)      f32
    o_ref:  (BB, T, Ck)               f32
    """
    x = x_ref[...].astype(jnp.float32)
    feat = _conv1d_same(x, cw_ref[...], cb_ref[...])          # convert_conv (no act)
    for i in range(BLOCKS + 1):
        # torch block: ReLU -> Conv1d -> ReLU -> Conv1d, then residual add.
        # F.max_pool1d(kernel=1, stride=1) between blocks is the identity.
        h = _conv1d_same(jnp.maximum(feat, 0.0), w_ref[i, 0], b_ref[i, 0])
        h = _conv1d_same(jnp.maximum(h, 0.0), w_ref[i, 1], b_ref[i, 1])
        feat = feat + h
    o_ref[...] = feat.astype(o_ref.dtype)


def _choose_batch_block(B, T, C):
    """Largest batch tile that (a) divides B, (b) fits a conservative VMEM
    activation budget, and (c) keeps the parallel grid length >= 2 when
    possible so a v7x chip's second TensorCore gets work."""
    budget = 16 << 20                       # activation working-set budget
    per_batch = max(1, T * C * 4 * 12)      # x, feat, h, im2col, I/O dbl-buffer
    bb = max(1, min(B, budget // per_batch))
    while B % bb:
        bb -= 1
    if bb == B and B >= 2:                  # keep >= 2 grid steps for megacore
        bb = max(1, B // 2)
        while B % bb:
            bb -= 1
    return bb


def pallas_conv_stack(x, params):
    """Run the full DPCNN conv stack in one pallas_call. x: (B, T, D) f32."""
    B, T, cin = x.shape
    ck = NUM_KERNELS

    # Weights to im2col layout, bf16 (halves weight DMA, bf16-native MXU).
    cw = params["convert_w"].reshape(KERNEL_SIZE * cin, ck).astype(jnp.bfloat16)
    cb = params["convert_b"].astype(jnp.float32)
    ws = jnp.stack([
        jnp.stack([params[f"conv{i}_w1"].reshape(KERNEL_SIZE * ck, ck),
                   params[f"conv{i}_w2"].reshape(KERNEL_SIZE * ck, ck)])
        for i in range(BLOCKS + 1)]).astype(jnp.bfloat16)      # (BLOCKS+1,2,3Ck,Ck)
    bs = jnp.stack([
        jnp.stack([params[f"conv{i}_b1"], params[f"conv{i}_b2"]])
        for i in range(BLOCKS + 1)]).astype(jnp.float32)       # (BLOCKS+1,2,1,Ck)

    bb = _choose_batch_block(B, T, max(cin, ck))
    grid = (B // bb,)

    return pl.pallas_call(
        _conv_stack_kernel,
        out_shape=jax.ShapeDtypeStruct((B, T, ck), jnp.float32),
        grid=grid,
        in_specs=[
            pl.BlockSpec((bb, T, cin), lambda i: (i, 0, 0)),
            # constant index_map => weights stay VMEM-resident across the grid
            pl.BlockSpec((KERNEL_SIZE * cin, ck), lambda i: (0, 0)),
            pl.BlockSpec((1, ck), lambda i: (0, 0)),
            pl.BlockSpec((BLOCKS + 1, 2, KERNEL_SIZE * ck, ck),
                         lambda i: (0, 0, 0, 0)),
            pl.BlockSpec((BLOCKS + 1, 2, 1, ck), lambda i: (0, 0, 0, 0)),
        ],
        out_specs=pl.BlockSpec((bb, T, ck), lambda i: (i, 0, 0)),
        compiler_params=pltpu.CompilerParams(
            dimension_semantics=("parallel",),
            vmem_limit_bytes=48 * 1024 * 1024,   # < v7x 64 MiB physical
        ),
    )(x, cw, cb, ws, bs)


# ---------------- plain-JAX glue: embedders, LSTM, output head ----------------
def make_frac_table(d_model, resolution):
    # CrabNet-style FractionalEncoder table: (resolution, d_model//2)
    d_half = d_model // 2
    x = jnp.linspace(0.0, resolution - 1, resolution).reshape(resolution, 1)
    fraction = jnp.linspace(0.0, d_half - 1, d_half).reshape(1, d_half)
    pe = jnp.zeros((resolution, d_half), jnp.float32)
    pe = pe.at[:, 0::2].set(jnp.sin(x / jnp.power(50.0, 2 * fraction[:, 0::2] / d_half)))
    pe = pe.at[:, 1::2].set(jnp.cos(x / jnp.power(50.0, 2 * fraction[:, 1::2] / d_half)))
    return pe


def frac_encode(frac, table, resolution, use_log):
    x = frac.astype(jnp.float32)
    if use_log:
        x = 0.0025 * (jnp.log2(x)) ** 2
        x = jnp.where(x > 1.0, 1.0, x)
    x = jnp.where(x < 1.0 / resolution, 1.0 / resolution, x)
    idx = jnp.round(x * resolution).astype(jnp.int32) - 1
    return table[idx]                              # (B, T, d_model//2)


def bidir_lstm(x, params):
    """Bidirectional single-layer LSTM; both directions share one lax.scan."""
    B, T, _ = x.shape
    H = HIDDEN
    w_ih = jnp.stack([params["lstm_fwd_w_ih"], params["lstm_bwd_w_ih"]])   # (2,4H,E)
    w_hh = jnp.stack([params["lstm_fwd_w_hh"], params["lstm_bwd_w_hh"]])   # (2,4H,H)
    bias = jnp.stack([params["lstm_fwd_b_ih"] + params["lstm_fwd_b_hh"],
                      params["lstm_bwd_b_ih"] + params["lstm_bwd_b_hh"]])  # (2,4H)

    # Direction 0: forward time; direction 1: reversed time.
    x2 = jnp.stack([x, x[:, ::-1]], axis=0)                                # (2,B,T,E)
    xs = jnp.einsum("dbte,dge->dbtg", x2, w_ih) + bias[:, None, None, :]   # (2,B,T,4H)
    xs = jnp.moveaxis(xs, 2, 0)                                            # (T,2,B,4H)

    def step(carry, xt):
        h, c = carry                                                       # (2,B,H)
        gates = xt + jnp.einsum("dbh,dgh->dbg", h, w_hh)
        i = jax.nn.sigmoid(gates[..., :H])          # PyTorch gate order (i,f,g,o)
        f = jax.nn.sigmoid(gates[..., H:2 * H])
        g = jnp.tanh(gates[..., 2 * H:3 * H])
        o = jax.nn.sigmoid(gates[..., 3 * H:])
        c = f * c + i * g
        h = o * jnp.tanh(c)
        return (h, c), h

    init = (jnp.zeros((2, B, H), jnp.float32), jnp.zeros((2, B, H), jnp.float32))
    _, hs = lax.scan(step, init, xs)                                       # (T,2,B,H)
    hs = jnp.moveaxis(hs, 0, 2)                                            # (2,B,T,H)
    h_f = hs[0]
    h_b = hs[1][:, ::-1]
    return jnp.concatenate([h_f, h_b], axis=-1)                            # (B,T,2H)
# TODO(synk): LSTM recurrence is inherently sequential; it stays in lax.scan
# (fused across directions) while the DPCNN conv stack runs inside Pallas.


def init_params(key):
    keys = iter(jax.random.split(key, 64))
    nxt = lambda: next(keys)
    nrm = lambda k, shape, s=0.05: (jax.random.normal(k, shape, jnp.float32) * s)

    p = {}
    # ElementEmbedder: simple embedding lookup table (definition not provided).
    p["embed_table"] = nrm(nxt(), (VOCAB, D_MODEL), 0.1)
    p["emb_scaler"] = jnp.float32(1.0)
    p["pos_scaler"] = jnp.float32(1.0)
    p["pos_scaler_log"] = jnp.float32(1.0)
    # StoichiometryEmbedder tables (sinusoidal, CrabNet-style).
    p["pe_table"] = make_frac_table(D_MODEL, RESOLUTION)
    p["ple_table"] = make_frac_table(D_MODEL, RESOLUTION)
    # Bidirectional single-layer LSTM.
    for d in ("fwd", "bwd"):
        p[f"lstm_{d}_w_ih"] = nrm(nxt(), (4 * HIDDEN, D_MODEL))
        p[f"lstm_{d}_w_hh"] = nrm(nxt(), (4 * HIDDEN, HIDDEN))
        p[f"lstm_{d}_b_ih"] = nrm(nxt(), (4 * HIDDEN,))
        p[f"lstm_{d}_b_hh"] = nrm(nxt(), (4 * HIDDEN,))
    # convert_conv: Conv1d(embed -> num_kernels, k=3), stored (k, Cin, Cout).
    # (PyTorch stores Conv1d weights as (Cout, Cin, k); transpose(2,1,0) to port.)
    p["convert_w"] = nrm(nxt(), (KERNEL_SIZE, D_MODEL, NUM_KERNELS))
    p["convert_b"] = nrm(nxt(), (1, NUM_KERNELS))
    # convs[i]: ReLU, Conv1d, ReLU, Conv1d  for i in 0..BLOCKS
    for i in range(BLOCKS + 1):
        p[f"conv{i}_w1"] = nrm(nxt(), (KERNEL_SIZE, NUM_KERNELS, NUM_KERNELS))
        p[f"conv{i}_b1"] = nrm(nxt(), (1, NUM_KERNELS))
        p[f"conv{i}_w2"] = nrm(nxt(), (KERNEL_SIZE, NUM_KERNELS, NUM_KERNELS))
        p[f"conv{i}_b2"] = nrm(nxt(), (1, NUM_KERNELS))
    # OutputNN: linear head filter_map -> out_dims (definition not provided).
    p["out_w"] = nrm(nxt(), (OUT_DIMS, NUM_KERNELS))
    p["out_b"] = nrm(nxt(), (OUT_DIMS,))
    return p


def lgdcnn_forward(params, src, frac):
    B, T = src.shape
    # --- BaseModel.embed ---
    x = params["embed_table"][src] * (2.0 ** params["emb_scaler"])        # (B,T,D)
    # --- BaseModel._calculate_pe ---
    pe_scaler = 2.0 ** (1.0 - params["pos_scaler"]) ** 2
    ple_scaler = 2.0 ** (1.0 - params["pos_scaler_log"]) ** 2
    pe = frac_encode(frac, params["pe_table"], RESOLUTION, use_log=False) * pe_scaler
    ple = frac_encode(frac, params["ple_table"], RESOLUTION, use_log=True) * ple_scaler
    all_pe = jnp.concatenate([pe, ple], axis=-1)                          # (B,T,D)
    x_src = x + all_pe

    # --- multi_lstm_dpcnnmodify ---
    emb = bidir_lstm(x_src, params)                                       # (B,T,2H)=(B,T,C)

    # torch permutes to NCW around the conv stack; we stay channels-last.
    feat = pallas_conv_stack(emb, params)                                 # fused Pallas stack

    # --- LGDCNN._process_output ---
    out = feat @ params["out_w"].T + params["out_b"]                      # (B,T,OUT_DIMS)
    mask = jnp.broadcast_to((src == 0)[:, :, None], (B, T, OUT_DIMS))
    out = jnp.where(mask, 0.0, out)
    count = jnp.maximum(jnp.sum(~mask, axis=1), 1)                        # guard all-pad rows
    out = out.sum(axis=1) / count                                         # (B, OUT_DIMS)
    half = (OUT_DIMS + 1) // 2                                            # chunk(2, -1)
    pred, logits = out[:, :half], out[:, half:]
    prob = jnp.concatenate(
        [jax.nn.sigmoid(logits),
         jnp.ones((B, half - logits.shape[-1]), out.dtype)], axis=-1)
    return pred * prob                                                    # (B, half)


if __name__ == "__main__":
    key = jax.random.PRNGKey(0)
    pkey, fkey = jax.random.split(key, 2)
    params = init_params(pkey)

    B, T = 2, 8
    src = jnp.array([[12, 5, 7, 3, 0, 0, 0, 0],
                     [8, 22, 14, 9, 31, 2, 0, 0]], dtype=jnp.int32)
    raw = jax.random.uniform(fkey, (B, T), minval=0.1, maxval=1.0)
    raw = jnp.where(src == 0, 0.0, raw)
    frac = raw / jnp.sum(raw, axis=1, keepdims=True)                      # fractions, 0 at pads

    fwd = jax.jit(functools.partial(lgdcnn_forward, params))
    out = fwd(src, frac)
    jax.block_until_ready(out)
    assert out.shape == (B, (OUT_DIMS + 1) // 2)
    print("KERNEL_OK")
</pallas_src>

<mosaic_0001>
module attributes {stable_mosaic.version = 11 : i64} {
  func.func @_conv_stack_kernel(%arg0: i32, %arg1: memref<1x8x128xf32, #tpu.memory_space<vmem>>, %arg2: memref<384x128xbf16, #tpu.memory_space<vmem>>, %arg3: memref<1x128xf32, #tpu.memory_space<vmem>>, %arg4: memref<3x2x384x128xbf16, #tpu.memory_space<vmem>>, %arg5: memref<3x2x1x128xf32, #tpu.memory_space<vmem>>, %arg6: memref<1x8x128xf32, #tpu.memory_space<vmem>>) attributes {dimension_semantics = [#tpu.dimension_semantics<parallel>], iteration_bounds = array<i64: 2>, scalar_prefetch = 0 : i64, scratch_operands = 0 : i64, tpu.core_type = #tpu.core_type<tc>, window_params = [{transform_indices = @transform_0, window_bounds = array<i64: 1, 8, 128>}, {pipeline_mode = #tpu.pipeline_mode<synchronous>, transform_indices = @transform_1, window_bounds = array<i64: 384, 128>}, {pipeline_mode = #tpu.pipeline_mode<synchronous>, transform_indices = @transform_2, window_bounds = array<i64: 1, 128>}, {pipeline_mode = #tpu.pipeline_mode<synchronous>, transform_indices = @transform_3, window_bounds = array<i64: 3, 2, 384, 128>}, {pipeline_mode = #tpu.pipeline_mode<synchronous>, transform_indices = @transform_4, window_bounds = array<i64: 3, 2, 1, 128>}, {transform_indices = @transform_5, window_bounds = array<i64: 1, 8, 128>}]} {
    %c0 = arith.constant 0 : index
    %c0_0 = arith.constant 0 : index
    %c0_1 = arith.constant 0 : index
    %0 = vector.load %arg1[%c0, %c0_0, %c0_1] : memref<1x8x128xf32, #tpu.memory_space<vmem>>, vector<1x8x128xf32>
    %c0_2 = arith.constant 0 : index
    %c0_3 = arith.constant 0 : index
    %1 = vector.load %arg2[%c0_2, %c0_3] : memref<384x128xbf16, #tpu.memory_space<vmem>>, vector<384x128xbf16>
    %c0_4 = arith.constant 0 : index
    %c0_5 = arith.constant 0 : index
    %2 = vector.load %arg3[%c0_4, %c0_5] : memref<1x128xf32, #tpu.memory_space<vmem>>, vector<1x128xf32>
    %cst = arith.constant 0.000000e+00 : f32
    %3 = vector.broadcast %cst : f32 to vector<1x1x128xf32>
    %4 = vector.extract_strided_slice %0 {offsets = [0, 0, 0], sizes = [1, 7, 128], strides = [1, 1, 1]} : vector<1x8x128xf32> to vector<1x7x128xf32>
    %5 = tpu.concatenate %3, %4 in 1 : vector<1x1x128xf32>, vector<1x7x128xf32> -> vector<1x8x128xf32>
    %6 = vector.extract_strided_slice %0 {offsets = [0, 1, 0], sizes = [1, 7, 128], strides = [1, 1, 1]} : vector<1x8x128xf32> to vector<1x7x128xf32>
    %7 = tpu.concatenate %6, %3 in 1 : vector<1x7x128xf32>, vector<1x1x128xf32> -> vector<1x8x128xf32>
    %8 = tpu.concatenate %5, %0, %7 in 2 : vector<1x8x128xf32>, vector<1x8x128xf32>, vector<1x8x128xf32> -> vector<1x8x384xf32>
    %9 = arith.truncf %8 : vector<1x8x384xf32> to vector<1x8x384xbf16>
    %10 = vector.shape_cast %9 : vector<1x8x384xbf16> to vector<8x384xbf16>
    %cst_6 = arith.constant dense<0.000000e+00> : vector<8x128xf32>
    %11 = tpu.matmul %10, %1, %cst_6 {dimension_numbers = #tpu.dot_dimension_numbers<[1], [0], [0], [1], [0, 0, 1, 1], [], []>} : vector<8x384xbf16>, vector<384x128xbf16>, vector<8x128xf32> -> vector<8x128xf32>
    %12 = vector.shape_cast %11 : vector<8x128xf32> to vector<1x8x128xf32>
    %13 = vector.shape_cast %2 : vector<1x128xf32> to vector<1x1x128xf32>
    %14 = vector.broadcast %13 : vector<1x1x128xf32> to vector<1x8x128xf32>
    %15 = arith.addf %12, %14 : vector<1x8x128xf32>
    %cst_7 = arith.constant 0.000000e+00 : f32
    %16 = vector.broadcast %cst_7 : f32 to vector<1x8x128xf32>
    %17 = arith.maximumf %15, %16 : vector<1x8x128xf32>
    %c0_8 = arith.constant 0 : index
    %c0_9 = arith.constant 0 : index
    %c0_10 = arith.constant 0 : index
    %c0_11 = arith.constant 0 : index
    %18 = vector.load %arg4[%c0_8, %c0_9, %c0_10, %c0_11] : memref<3x2x384x128xbf16, #tpu.memory_space<vmem>>, vector<1x1x384x128xbf16>
    %19 = vector.shape_cast %18 : vector<1x1x384x128xbf16> to vector<384x128xbf16>
    %c0_12 = arith.constant 0 : index
    %c0_13 = arith.constant 0 : index
    %c0_14 = arith.constant 0 : index
    %c0_15 = arith.constant 0 : index
    %20 = vector.load %arg5[%c0_12, %c0_13, %c0_14, %c0_15] : memref<3x2x1x128xf32, #tpu.memory_space<vmem>>, vector<1x1x1x128xf32>
    %21 = vector.shape_cast %20 : vector<1x1x1x128xf32> to vector<1x128xf32>
    %cst_16 = arith.constant 0.000000e+00 : f32
    %22 = vector.broadcast %cst_16 : f32 to vector<1x1x128xf32>
    %23 = vector.extract_strided_slice %17 {offsets = [0, 0, 0], sizes = [1, 7, 128], strides = [1, 1, 1]} : vector<1x8x128xf32> to vector<1x7x128xf32>
    %24 = tpu.concatenate %22, %23 in 1 : vector<1x1x128xf32>, vector<1x7x128xf32> -> vector<1x8x128xf32>
    %25 = vector.extract_strided_slice %17 {offsets = [0, 1, 0], sizes = [1, 7, 128], strides = [1, 1, 1]} : vector<1x8x128xf32> to vector<1x7x128xf32>
    %26 = tpu.concatenate %25, %22 in 1 : vector<1x7x128xf32>, vector<1x1x128xf32> -> vector<1x8x128xf32>
    %27 = tpu.concatenate %24, %17, %26 in 2 : vector<1x8x128xf32>, vector<1x8x128xf32>, vector<1x8x128xf32> -> vector<1x8x384xf32>
    %28 = arith.truncf %27 : vector<1x8x384xf32> to vector<1x8x384xbf16>
    %29 = vector.shape_cast %28 : vector<1x8x384xbf16> to vector<8x384xbf16>
    %cst_17 = arith.constant dense<0.000000e+00> : vector<8x128xf32>
    %30 = tpu.matmul %29, %19, %cst_17 {dimension_numbers = #tpu.dot_dimension_numbers<[1], [0], [0], [1], [0, 0, 1, 1], [], []>} : vector<8x384xbf16>, vector<384x128xbf16>, vector<8x128xf32> -> vector<8x128xf32>
    %31 = vector.shape_cast %30 : vector<8x128xf32> to vector<1x8x128xf32>
    %32 = vector.shape_cast %21 : vector<1x128xf32> to vector<1x1x128xf32>
    %33 = vector.broadcast %32 : vector<1x1x128xf32> to vector<1x8x128xf32>
    %34 = arith.addf %31, %33 : vector<1x8x128xf32>
    %cst_18 = arith.constant 0.000000e+00 : f32
    %35 = vector.broadcast %cst_18 : f32 to vector<1x8x128xf32>
    %36 = arith.maximumf %34, %35 : vector<1x8x128xf32>
    %c0_19 = arith.constant 0 : index
    %c1 = arith.constant 1 : index
    %c0_20 = arith.constant 0 : index
    %c0_21 = arith.constant 0 : index
    %37 = vector.load %arg4[%c0_19, %c1, %c0_20, %c0_21] : memref<3x2x384x128xbf16, #tpu.memory_space<vmem>>, vector<1x1x384x128xbf16>
    %38 = vector.shape_cast %37 : vector<1x1x384x128xbf16> to vector<384x128xbf16>
    %c0_22 = arith.constant 0 : index
    %c1_23 = arith.constant 1 : index
    %c0_24 = arith.constant 0 : index
    %c0_25 = arith.constant 0 : index
    %39 = vector.load %arg5[%c0_22, %c1_23, %c0_24, %c0_25] : memref<3x2x1x128xf32, #tpu.memory_space<vmem>>, vector<1x1x1x128xf32>
    %40 = vector.shape_cast %39 : vector<1x1x1x128xf32> to vector<1x128xf32>
    %cst_26 = arith.constant 0.000000e+00 : f32
    %41 = vector.broadcast %cst_26 : f32 to vector<1x1x128xf32>
    %42 = vector.extract_strided_slice %36 {offsets = [0, 0, 0], sizes = [1, 7, 128], strides = [1, 1, 1]} : vector<1x8x128xf32> to vector<1x7x128xf32>
    %43 = tpu.concatenate %41, %42 in 1 : vector<1x1x128xf32>, vector<1x7x128xf32> -> vector<1x8x128xf32>
    %44 = vector.extract_strided_slice %36 {offsets = [0, 1, 0], sizes = [1, 7, 128], strides = [1, 1, 1]} : vector<1x8x128xf32> to vector<1x7x128xf32>
    %45 = tpu.concatenate %44, %41 in 1 : vector<1x7x128xf32>, vector<1x1x128xf32> -> vector<1x8x128xf32>
    %46 = tpu.concatenate %43, %36, %45 in 2 : vector<1x8x128xf32>, vector<1x8x128xf32>, vector<1x8x128xf32> -> vector<1x8x384xf32>
    %47 = arith.truncf %46 : vector<1x8x384xf32> to vector<1x8x384xbf16>
    %48 = vector.shape_cast %47 : vector<1x8x384xbf16> to vector<8x384xbf16>
    %cst_27 = arith.constant dense<0.000000e+00> : vector<8x128xf32>
    %49 = tpu.matmul %48, %38, %cst_27 {dimension_numbers = #tpu.dot_dimension_numbers<[1], [0], [0], [1], [0, 0, 1, 1], [], []>} : vector<8x384xbf16>, vector<384x128xbf16>, vector<8x128xf32> -> vector<8x128xf32>
    %50 = vector.shape_cast %49 : vector<8x128xf32> to vector<1x8x128xf32>
    %51 = vector.shape_cast %40 : vector<1x128xf32> to vector<1x1x128xf32>
    %52 = vector.broadcast %51 : vector<1x1x128xf32> to vector<1x8x128xf32>
    %53 = arith.addf %50, %52 : vector<1x8x128xf32>
    %54 = arith.addf %15, %53 : vector<1x8x128xf32>
    %cst_28 = arith.constant 0.000000e+00 : f32
    %55 = vector.broadcast %cst_28 : f32 to vector<1x8x128xf32>
    %56 = arith.maximumf %54, %55 : vector<1x8x128xf32>
    %c1_29 = arith.constant 1 : index
    %c0_30 = arith.constant 0 : index
    %c0_31 = arith.constant 0 : index
    %c0_32 = arith.constant 0 : index
    %57 = vector.load %arg4[%c1_29, %c0_30, %c0_31, %c0_32] : memref<3x2x384x128xbf16, #tpu.memory_space<vmem>>, vector<1x1x384x128xbf16>
    %58 = vector.shape_cast %57 : vector<1x1x384x128xbf16> to vector<384x128xbf16>
    %c1_33 = arith.constant 1 : index
    %c0_34 = arith.constant 0 : index
    %c0_35 = arith.constant 0 : index
    %c0_36 = arith.constant 0 : index
    %59 = vector.load %arg5[%c1_33, %c0_34, %c0_35, %c0_36] : memref<3x2x1x128xf32, #tpu.memory_space<vmem>>, vector<1x1x1x128xf32>
    %60 = vector.shape_cast %59 : vector<1x1x1x128xf32> to vector<1x128xf32>
    %cst_37 = arith.constant 0.000000e+00 : f32
    %61 = vector.broadcast %cst_37 : f32 to vector<1x1x128xf32>
    %62 = vector.extract_strided_slice %56 {offsets = [0, 0, 0], sizes = [1, 7, 128], strides = [1, 1, 1]} : vector<1x8x128xf32> to vector<1x7x128xf32>
    %63 = tpu.concatenate %61, %62 in 1 : vector<1x1x128xf32>, vector<1x7x128xf32> -> vector<1x8x128xf32>
    %64 = vector.extract_strided_slice %56 {offsets = [0, 1, 0], sizes = [1, 7, 128], strides = [1, 1, 1]} : vector<1x8x128xf32> to vector<1x7x128xf32>
    %65 = tpu.concatenate %64, %61 in 1 : vector<1x7x128xf32>, vector<1x1x128xf32> -> vector<1x8x128xf32>
    %66 = tpu.concatenate %63, %56, %65 in 2 : vector<1x8x128xf32>, vector<1x8x128xf32>, vector<1x8x128xf32> -> vector<1x8x384xf32>
    %67 = arith.truncf %66 : vector<1x8x384xf32> to vector<1x8x384xbf16>
    %68 = vector.shape_cast %67 : vector<1x8x384xbf16> to vector<8x384xbf16>
    %cst_38 = arith.constant dense<0.000000e+00> : vector<8x128xf32>
    %69 = tpu.matmul %68, %58, %cst_38 {dimension_numbers = #tpu.dot_dimension_numbers<[1], [0], [0], [1], [0, 0, 1, 1], [], []>} : vector<8x384xbf16>, vector<384x128xbf16>, vector<8x128xf32> -> vector<8x128xf32>
    %70 = vector.shape_cast %69 : vector<8x128xf32> to vector<1x8x128xf32>
    %71 = vector.shape_cast %60 : vector<1x128xf32> to vector<1x1x128xf32>
    %72 = vector.broadcast %71 : vector<1x1x128xf32> to vector<1x8x128xf32>
    %73 = arith.addf %70, %72 : vector<1x8x128xf32>
    %cst_39 = arith.constant 0.000000e+00 : f32
    %74 = vector.broadcast %cst_39 : f32 to vector<1x8x128xf32>
    %75 = arith.maximumf %73, %74 : vector<1x8x128xf32>
    %c1_40 = arith.constant 1 : index
    %c1_41 = arith.constant 1 : index
    %c0_42 = arith.constant 0 : index
    %c0_43 = arith.constant 0 : index
    %76 = vector.load %arg4[%c1_40, %c1_41, %c0_42, %c0_43] : memref<3x2x384x128xbf16, #tpu.memory_space<vmem>>, vector<1x1x384x128xbf16>
    %77 = vector.shape_cast %76 : vector<1x1x384x128xbf16> to vector<384x128xbf16>
    %c1_44 = arith.constant 1 : index
    %c1_45 = arith.constant 1 : index
    %c0_46 = arith.constant 0 : index
    %c0_47 = arith.constant 0 : index
    %78 = vector.load %arg5[%c1_44, %c1_45, %c0_46, %c0_47] : memref<3x2x1x128xf32, #tpu.memory_space<vmem>>, vector<1x1x1x128xf32>
    %79 = vector.shape_cast %78 : vector<1x1x1x128xf32> to vector<1x128xf32>
    %cst_48 = arith.constant 0.000000e+00 : f32
    %80 = vector.broadcast %cst_48 : f32 to vector<1x1x128xf32>
    %81 = vector.extract_strided_slice %75 {offsets = [0, 0, 0], sizes = [1, 7, 128], strides = [1, 1, 1]} : vector<1x8x128xf32> to vector<1x7x128xf32>
    %82 = tpu.concatenate %80, %81 in 1 : vector<1x1x128xf32>, vector<1x7x128xf32> -> vector<1x8x128xf32>
    %83 = vector.extract_strided_slice %75 {offsets = [0, 1, 0], sizes = [1, 7, 128], strides = [1, 1, 1]} : vector<1x8x128xf32> to vector<1x7x128xf32>
    %84 = tpu.concatenate %83, %80 in 1 : vector<1x7x128xf32>, vector<1x1x128xf32> -> vector<1x8x128xf32>
    %85 = tpu.concatenate %82, %75, %84 in 2 : vector<1x8x128xf32>, vector<1x8x128xf32>, vector<1x8x128xf32> -> vector<1x8x384xf32>
    %86 = arith.truncf %85 : vector<1x8x384xf32> to vector<1x8x384xbf16>
    %87 = vector.shape_cast %86 : vector<1x8x384xbf16> to vector<8x384xbf16>
    %cst_49 = arith.constant dense<0.000000e+00> : vector<8x128xf32>
    %88 = tpu.matmul %87, %77, %cst_49 {dimension_numbers = #tpu.dot_dimension_numbers<[1], [0], [0], [1], [0, 0, 1, 1], [], []>} : vector<8x384xbf16>, vector<384x128xbf16>, vector<8x128xf32> -> vector<8x128xf32>
    %89 = vector.shape_cast %88 : vector<8x128xf32> to vector<1x8x128xf32>
    %90 = vector.shape_cast %79 : vector<1x128xf32> to vector<1x1x128xf32>
    %91 = vector.broadcast %90 : vector<1x1x128xf32> to vector<1x8x128xf32>
    %92 = arith.addf %89, %91 : vector<1x8x128xf32>
    %93 = arith.addf %54, %92 : vector<1x8x128xf32>
    %cst_50 = arith.constant 0.000000e+00 : f32
    %94 = vector.broadcast %cst_50 : f32 to vector<1x8x128xf32>
    %95 = arith.maximumf %93, %94 : vector<1x8x128xf32>
    %c2 = arith.constant 2 : index
    %c0_51 = arith.constant 0 : index
    %c0_52 = arith.constant 0 : index
    %c0_53 = arith.constant 0 : index
    %96 = vector.load %arg4[%c2, %c0_51, %c0_52, %c0_53] : memref<3x2x384x128xbf16, #tpu.memory_space<vmem>>, vector<1x1x384x128xbf16>
    %97 = vector.shape_cast %96 : vector<1x1x384x128xbf16> to vector<384x128xbf16>
    %c2_54 = arith.constant 2 : index
    %c0_55 = arith.constant 0 : index
    %c0_56 = arith.constant 0 : index
    %c0_57 = arith.constant 0 : index
    %98 = vector.load %arg5[%c2_54, %c0_55, %c0_56, %c0_57] : memref<3x2x1x128xf32, #tpu.memory_space<vmem>>, vector<1x1x1x128xf32>
    %99 = vector.shape_cast %98 : vector<1x1x1x128xf32> to vector<1x128xf32>
    %cst_58 = arith.constant 0.000000e+00 : f32
    %100 = vector.broadcast %cst_58 : f32 to vector<1x1x128xf32>
    %101 = vector.extract_strided_slice %95 {offsets = [0, 0, 0], sizes = [1, 7, 128], strides = [1, 1, 1]} : vector<1x8x128xf32> to vector<1x7x128xf32>
    %102 = tpu.concatenate %100, %101 in 1 : vector<1x1x128xf32>, vector<1x7x128xf32> -> vector<1x8x128xf32>
    %103 = vector.extract_strided_slice %95 {offsets = [0, 1, 0], sizes = [1, 7, 128], strides = [1, 1, 1]} : vector<1x8x128xf32> to vector<1x7x128xf32>
    %104 = tpu.concatenate %103, %100 in 1 : vector<1x7x128xf32>, vector<1x1x128xf32> -> vector<1x8x128xf32>
    %105 = tpu.concatenate %102, %95, %104 in 2 : vector<1x8x128xf32>, vector<1x8x128xf32>, vector<1x8x128xf32> -> vector<1x8x384xf32>
    %106 = arith.truncf %105 : vector<1x8x384xf32> to vector<1x8x384xbf16>
    %107 = vector.shape_cast %106 : vector<1x8x384xbf16> to vector<8x384xbf16>
    %cst_59 = arith.constant dense<0.000000e+00> : vector<8x128xf32>
    %108 = tpu.matmul %107, %97, %cst_59 {dimension_numbers = #tpu.dot_dimension_numbers<[1], [0], [0], [1], [0, 0, 1, 1], [], []>} : vector<8x384xbf16>, vector<384x128xbf16>, vector<8x128xf32> -> vector<8x128xf32>
    %109 = vector.shape_cast %108 : vector<8x128xf32> to vector<1x8x128xf32>
    %110 = vector.shape_cast %99 : vector<1x128xf32> to vector<1x1x128xf32>
    %111 = vector.broadcast %110 : vector<1x1x128xf32> to vector<1x8x128xf32>
    %112 = arith.addf %109, %111 : vector<1x8x128xf32>
    %cst_60 = arith.constant 0.000000e+00 : f32
    %113 = vector.broadcast %cst_60 : f32 to vector<1x8x128xf32>
    %114 = arith.maximumf %112, %113 : vector<1x8x128xf32>
    %c2_61 = arith.constant 2 : index
    %c1_62 = arith.constant 1 : index
    %c0_63 = arith.constant 0 : index
    %c0_64 = arith.constant 0 : index
    %115 = vector.load %arg4[%c2_61, %c1_62, %c0_63, %c0_64] : memref<3x2x384x128xbf16, #tpu.memory_space<vmem>>, vector<1x1x384x128xbf16>
    %116 = vector.shape_cast %115 : vector<1x1x384x128xbf16> to vector<384x128xbf16>
    %c2_65 = arith.constant 2 : index
    %c1_66 = arith.constant 1 : index
    %c0_67 = arith.constant 0 : index
    %c0_68 = arith.constant 0 : index
    %117 = vector.load %arg5[%c2_65, %c1_66, %c0_67, %c0_68] : memref<3x2x1x128xf32, #tpu.memory_space<vmem>>, vector<1x1x1x128xf32>
    %118 = vector.shape_cast %117 : vector<1x1x1x128xf32> to vector<1x128xf32>
    %cst_69 = arith.constant 0.000000e+00 : f32
    %119 = vector.broadcast %cst_69 : f32 to vector<1x1x128xf32>
    %120 = vector.extract_strided_slice %114 {offsets = [0, 0, 0], sizes = [1, 7, 128], strides = [1, 1, 1]} : vector<1x8x128xf32> to vector<1x7x128xf32>
    %121 = tpu.concatenate %119, %120 in 1 : vector<1x1x128xf32>, vector<1x7x128xf32> -> vector<1x8x128xf32>
    %122 = vector.extract_strided_slice %114 {offsets = [0, 1, 0], sizes = [1, 7, 128], strides = [1, 1, 1]} : vector<1x8x128xf32> to vector<1x7x128xf32>
    %123 = tpu.concatenate %122, %119 in 1 : vector<1x7x128xf32>, vector<1x1x128xf32> -> vector<1x8x128xf32>
    %124 = tpu.concatenate %121, %114, %123 in 2 : vector<1x8x128xf32>, vector<1x8x128xf32>, vector<1x8x128xf32> -> vector<1x8x384xf32>
    %125 = arith.truncf %124 : vector<1x8x384xf32> to vector<1x8x384xbf16>
    %126 = vector.shape_cast %125 : vector<1x8x384xbf16> to vector<8x384xbf16>
    %cst_70 = arith.constant dense<0.000000e+00> : vector<8x128xf32>
    %127 = tpu.matmul %126, %116, %cst_70 {dimension_numbers = #tpu.dot_dimension_numbers<[1], [0], [0], [1], [0, 0, 1, 1], [], []>} : vector<8x384xbf16>, vector<384x128xbf16>, vector<8x128xf32> -> vector<8x128xf32>
    %128 = vector.shape_cast %127 : vector<8x128xf32> to vector<1x8x128xf32>
    %129 = vector.shape_cast %118 : vector<1x128xf32> to vector<1x1x128xf32>
    %130 = vector.broadcast %129 : vector<1x1x128xf32> to vector<1x8x128xf32>
    %131 = arith.addf %128, %130 : vector<1x8x128xf32>
    %132 = arith.addf %93, %131 : vector<1x8x128xf32>
    %c0_71 = arith.constant 0 : index
    %c0_72 = arith.constant 0 : index
    %c0_73 = arith.constant 0 : index
    %133 = vector.load %arg6[%c0_71, %c0_72, %c0_73] : memref<1x8x128xf32, #tpu.memory_space<vmem>>, vector<1x8x128xf32>
    tpu.vector_store %arg6[%c0_71, %c0_72, %c0_73], %132 {strides = array<i32>} : memref<1x8x128xf32, #tpu.memory_space<vmem>>, vector<1x8x128xf32>,
    return
  }
  func.func @transform_0(%arg0: i32) -> (i32, i32, i32) {
    %c0_i32 = arith.constant 0 : i32
    %c0_i32_0 = arith.constant 0 : i32
    %c0_i32_1 = arith.constant 0 : i32
    return %arg0, %c0_i32, %c0_i32_0 : i32, i32, i32
  }
  func.func @transform_1(%arg0: i32) -> (i32, i32) {
    %c0_i32 = arith.constant 0 : i32
    %c0_i32_0 = arith.constant 0 : i32
    %c0_i32_1 = arith.constant 0 : i32
    return %c0_i32, %c0_i32_0 : i32, i32
  }
  func.func @transform_2(%arg0: i32) -> (i32, i32) {
    %c0_i32 = arith.constant 0 : i32
    %c0_i32_0 = arith.constant 0 : i32
    %c0_i32_1 = arith.constant 0 : i32
    return %c0_i32, %c0_i32_0 : i32, i32
  }
  func.func @transform_3(%arg0: i32) -> (i32, i32, i32, i32) {
    %c0_i32 = arith.constant 0 : i32
    %c0_i32_0 = arith.constant 0 : i32
    %c0_i32_1 = arith.constant 0 : i32
    %c0_i32_2 = arith.constant 0 : i32
    %c0_i32_3 = arith.constant 0 : i32
    return %c0_i32, %c0_i32_0, %c0_i32_1, %c0_i32_2 : i32, i32, i32, i32
  }
  func.func @transform_4(%arg0: i32) -> (i32, i32, i32, i32) {
    %c0_i32 = arith.constant 0 : i32
    %c0_i32_0 = arith.constant 0 : i32
    %c0_i32_1 = arith.constant 0 : i32
    %c0_i32_2 = arith.constant 0 : i32
    %c0_i32_3 = arith.constant 0 : i32
    return %c0_i32, %c0_i32_0, %c0_i32_1, %c0_i32_2 : i32, i32, i32, i32
  }
  func.func @transform_5(%arg0: i32) -> (i32, i32, i32) {
    %c0_i32 = arith.constant 0 : i32
    %c0_i32_0 = arith.constant 0 : i32
    %c0_i32_1 = arith.constant 0 : i32
    return %arg0, %c0_i32, %c0_i32_0 : i32, i32, i32
  }
}

</mosaic_0001>

<bundles_post_ra>
// kernel: custom-call
= control target key start
LH: loop header
LB: loop body
LE: loop exit
PB: predicated region body
PF: predicated region fallthrough
CT: control target
= control target key end

     0   :  { %s6_s0 = inlined_call_operand.vmem [shape: f32[2,2,64], index: 0, kind: output, shape index: {}]  }

// kernel: custom-call.8
= control target key start
LH: loop header
LB: loop body
LE: loop exit
PB: predicated region body
PF: predicated region fallthrough
CT: control target
= control target key end

     0   :  { %s6_s0 = inlined_call_operand.vmem [shape: f32[8,2,2,64], index: 0, kind: output, shape index: {}]  }

// kernel: lgdcnn_forward.1
= control target key start
LH: loop header
LB: loop body
LE: loop exit
PB: predicated region body
PF: predicated region fallthrough
CT: control target
= control target key end

     0   :  { %10 = vsyncpa [#allocation3], 0  ;;  %s3222_s18 = smov 0   ;;  %s3479_s0 = inlined_call_operand.vmem [shape: f32[2,8,128], index: 0, kind: input, shape index: {}]   ;;  %s3480_s1 = inlined_call_operand.vmem [shape: bf16[384,128], index: 1, kind: input, shape index: {}]   ;;  %s3481_s2 = inlined_call_operand.vmem [shape: f32[1,128], index: 2, kind: input, shape index: {}]   ;;  %s3482_s3 = inlined_call_operand.hbm [shape: bf16[3,2,384,128], index: 3, kind: input, shape index: {}]   ;;  %s3483_s4 = inlined_call_operand.vmem [shape: f32[3,2,1,128], index: 4, kind: input, shape index: {}]   ;;  %s3484_s5 = inlined_call_operand.vmem [shape: f32[2,8,128], index: 5, kind: output, shape index: {}]  }
   0x1 LB: > { %s3228_s19 = sadd.s32 4294967295, %s3185_s18   ;;  %p2356_p0 = scmp.ge.s32.totalorder %s3185_s18, 1  ;;  %s3185_s18 = sphi %s3222_s18, %s16_s18  }
   0x2   : > { %p157_p1 = scmp.lt.s32.totalorder %s3185_s18, 3  ;;  %s3187_s20 = smov [#allocation2]  }
   0x3   : > { %s175_s21 = sshll.u32 %s3187_s20, 4  ;;  %p2966_p3 = scmp.eq.s32.totalorder %s3228_s19, 0  ;;  %s176_s21 = int_to_ptr.vmem [resolvable:$true] %s175_s21 }
   0x4   : > { %p3232_p2 = pnand %p2356_p0, %p157_p1  ;;  %s3160_s23 = scalar_lea.vmem %s176_s21, 18432 }
   0x5   : > { %p3161_p7 = scmp.ne.s32.totalorder %s176_s21, %s3160_s23  ;;  %p3168_p10 = scmp.lt.s32.totalorder %s176_s21, %s176_s21 }
   0x6   : > { %p2962_p4 = pneg %p3232_p2  ;;  %p3169_p11 = scmp.lt.s32.totalorder %s3160_s23, %s3160_s23 }
   0x8   : > { %p2963_p5 = pnand %p2966_p3, %p2962_p4  ;;  %p3170_p12 = por %p3169_p11, %p3168_p10 }
   0xa   : > { %p3151_p6 = pneg %p2963_p5 }
   0xc   : > { %p3163_p8 = pnand %p3161_p7, %p3151_p6 }
   0xe   : > { %p3164_p9 = pneg %p3163_p8 }
  0x10   : > { %p3171_p13 = pnand %p3170_p12, %p3164_p9 }
  0x12   : > { %3174 = shalt.err (!%p3171_p13)
}
  0x13   : > { %s3188_s24 = smov 64   ;;  %s3189_s25 = smov 4  }
  0x14   : > { %2965 = dma.hbm_to_vmem [thread:$0]  (!%p2963_p5), %s3482_s3, 18432, %s176_s21, [#allocation3], %s3188_s24, %s3188_s24, %s3189_s25  }
  0x15   : > { %201 = sbr.rel (%p3232_p2) target bundleno = 1511 (0x5e7), region = 40 }
  0x1a   : > { %3180 = dma.done.wait (%p2966_p3), [#allocation3], 18432  }
  0x1b   : > { %3182 = vsyncadd (%p2966_p3), [#allocation3], 4294948864  ;;  %v3190_v0 = vmov 0.0   ;;  %vm3191_vm0 = vmmov 0   ;;  %v2981_v1 = vld [vmem:[%s3480_s1 + $0x78] sm:$0xff]   ;;  %v2984_v4 = vld [vmem:[%s3480_s1 + $0x70] sm:$0xff]  }
  0x1c   : > { %2818 = vmatprep.subr.bf16.mxu1 %v3190_v0  ;;  %2834 = vmatprep.mubr.msk.bf16.mxu1 %vm3191_vm0, %v3190_v0  ;;  %v2982_v2 = vld [vmem:[%s3480_s1 + $0xb8] sm:$0xff]   ;;  %v2985_v5 = vld [vmem:[%s3480_s1 + $0xb0] sm:$0xff]   ;;  %v2987_v7 = vld [vmem:[%s3480_s1 + $0x68] sm:$0xff]   ;;  %p227_p0 = scmp.lt.s32.totalorder %s3228_s19, 1  ;;  %vm293_vm1 = vcmask 1046528   ;;  %vm289_vm2 = vcmask 1040384  }
  0x1d   : > { %2601 = vmatprep.subr.bf16.mxu0 %v2981_v1  ;;  %v2983_v3 = vld [vmem:[%s3480_s1 + $0x38] sm:$0xff]   ;;  %2819 = vmatpush3.bf16.msra.mxu1 %v2982_v2  ;;  %v2986_v6 = vld [vmem:[%s3480_s1 + $0x30] sm:$0xff]   ;;  %v2988_v8 = vld [vmem:[%s3480_s1 + $0xa8] sm:$0xff]  }
  0x1e   : > { %2602 = vmatpush3.bf16.msra.mxu0 %v2983_v3  ;;  %2820 = vmatprep.subr.bf16.mxu1 %v3190_v0  ;;  %v2989_v9 = vld [vmem:[%s3480_s1 + $0x28] sm:$0xff]   ;;  %v2990_v10 = vld [vmem:[%s3480_s1 + $0x60] sm:$0xff]   ;;  %v2993_v13 = vld [vmem:[%s3480_s1 + $0x58] sm:$0xff]   ;;  %s3491_s19 = smov (!%p227_p0, %s3228_s19), 1 }
  0x1f   : > { %2603 = vmatprep.subr.bf16.mxu0 %v2984_v4  ;;  %v2991_v11 = vld [vmem:[%s3480_s1 + $0xa0] sm:$0xff]   ;;  %v2994_v14 = vld [vmem:[%s3480_s1 + $0x98] sm:$0xff]   ;;  %v2996_v16 = vld [vmem:[%s3480_s1 + $0x50] sm:$0xff]   ;;  %s2361_s12 = sshll.u32 %s3491_s19, 3 }
  0x20   : > { %v2992_v12 = vld [vmem:[%s3480_s1 + $0x20] sm:$0xff]   ;;  %v2995_v15 = vld [vmem:[%s3480_s1 + $0x18] sm:$0xff]   ;;  %v2997_v17 = vld [vmem:[%s3480_s1 + $0x90] sm:$0xff]   ;;  %s230_s23 = scalar_lea.vmem %s3479_s0, %s2361_s12  ;;  %s234_s28 = scalar_lea.vmem %s3484_s5, %s2361_s12 }
  0x21   : > { %2821 = vmatpush3.bf16.msra.mxu1 %v2985_v5  ;;  %v2998_v18 = vld [vmem:[%s3480_s1 + $0x10] sm:$0xff]   ;;  %v2999_v19 = vld [vmem:[%s3480_s1 + $0x48] sm:$0xff]   ;;  %vm3331_vm3 = vmpackc.low %vm293_vm1, %vm293_vm1 }
  0x22   : > { %2604 = vmatpush3.bf16.msra.mxu0 %v2986_v6  ;;  %2822 = vmatprep.subr.bf16.mxu1 %v3190_v0  ;;  %v3000_v20 = vld [vmem:[%s3480_s1 + $0x88] sm:$0xff]   ;;  %v236_v23 = vld [vmem:[%s230_s23] sm:$0xff]  ;;  %vm2387_vm4 = vmneg %vm289_vm2 }
  0x23   : > { %2605 = vmatprep.subr.bf16.mxu0 %v2987_v7  ;;  %v3001_v21 = vld [vmem:[%s3480_s1 + $0x8] sm:$0xff]   ;;  %v3002_v24 = vld [vmem:[%s3480_s1 + $0x40] sm:$0xff]   ;;  %v291_v25 = vrot.slane %v236_v23, 1  ;;  %v296_v26 = vpack.c.bf16 %v236_v23, %v236_v23  ;;  %v287_v28 = vrot.slane %v236_v23, 7  ;;  %v3005_v30 = vld [vmem:[#allocation2 + $0x78] sm:$0xff]  }
  0x24   : > { %v3003_v27 = vld [vmem:[%s3480_s1 + $0x80] sm:$0xff]   ;;  %vm3346_vm5 = vmpackc.low %vm2387_vm4, %vm2387_vm4  ;;  %v3007_v34 = vld [vmem:[#allocation2 + $0xb8] sm:$0xff]  }
  0x25   : > { %2823 = vmatpush3.bf16.msra.mxu1 %v2988_v8  ;;  %474 = vmatprep.mubr.bf16.mxu0 %v296_v26  ;;  %v3004_v29 = vld [vmem:[%s3480_s1] sm:$0xff]   ;;  %v2393_v31 = vpack.c.bf16 %v291_v25, %v291_v25  ;;  %v2390_v33 = vpack.c.bf16 %v287_v28, %v287_v28  ;;  %v3006_v35 = vld [vmem:[#allocation2 + $0x38] sm:$0xff]   ;;  %v3008_v36 = vld [vmem:[#allocation2 + $0x70] sm:$0xff]  }
  0x26   : > { %2606 = vmatpush3.bf16.msra.mxu0 %v2989_v9  ;;  %2824 = vmatprep.subr.bf16.mxu1 %v3190_v0  ;;  %v3009_v37 = vld [vmem:[#allocation2 + $0x30] sm:$0xff]   ;;  %v3011_v39 = vld [vmem:[#allocation2 + $0x68] sm:$0xff]   ;;  %v3014_v42 = vld [vmem:[#allocation2 + $0x60] sm:$0xff]  }
  0x27   : > { %2607 = vmatprep.subr.bf16.mxu0 %v2990_v10  ;;  %v3010_v38 = vld [vmem:[#allocation2 + $0xb0] sm:$0xff]   ;;  %v3013_v40 = vld [vmem:[#allocation2 + $0xa8] sm:$0xff]   ;;  %v3016_v43 = vld [vmem:[#allocation2 + $0xa0] sm:$0xff]  }
  0x28   : > { %v3012_v41 = vld [vmem:[#allocation2 + $0x28] sm:$0xff]   ;;  %v3015_v44 = vld [vmem:[#allocation2 + $0x20] sm:$0xff]   ;;  %v3017_v45 = vld [vmem:[#allocation2 + $0x58] sm:$0xff]  }
  0x29   : > { %2825 = vmatpush3.bf16.msra.mxu1 %v2991_v11  ;;  %v3018_v46 = vld [vmem:[#allocation2 + $0x18] sm:$0xff]   ;;  %v3020_v48 = vld [vmem:[#allocation2 + $0x50] sm:$0xff]   ;;  %v3023_v51 = vld [vmem:[#allocation2 + $0x48] sm:$0xff]  }
  0x2a   : > { %2608 = vmatpush3.bf16.msra.mxu0 %v2992_v12  ;;  %2826 = vmatprep.subr.bf16.mxu1 %v3190_v0  ;;  %v3019_v47 = vld [vmem:[#allocation2 + $0x98] sm:$0xff]   ;;  %v3021_v49 = vld [vmem:[#allocation2 + $0x10] sm:$0xff]   ;;  %v3024_v52 = vld [vmem:[#allocation2 + $0x8] sm:$0xff]  }
  0x2b   : > { %2609 = vmatprep.subr.bf16.mxu0 %v2993_v13  ;;  %v3022_v50 = vld [vmem:[#allocation2 + $0x90] sm:$0xff]   ;;  %v3025_v53 = vld [vmem:[#allocation2 + $0x88] sm:$0xff]   ;;  %v3026_v54 = vld [vmem:[#allocation2 + $0x40] sm:$0xff]  }
  0x2c   : > { %v3027_v55 = vld [vmem:[#allocation2] sm:$0xff]   ;;  %v3029_v57 = vld [vmem:[#allocation2 + $0x138] sm:$0xff]   ;;  %v3044_v28 = vld [vmem:[#allocation2 + $0x110] sm:$0xff]  }
  0x2d   : > { %2827 = vmatpush3.bf16.msra.mxu1 %v2994_v14  ;;  %v3028_v56 = vld [vmem:[#allocation2 + $0x80] sm:$0xff]   ;;  %v3030_v11 = vld [vmem:[#allocation2 + $0xf8] sm:$0xff]  }
  0x2e   : > { %2610 = vmatpush3.bf16.msra.mxu0 %v2995_v15  ;;  %2828 = vmatprep.subr.bf16.mxu1 %v3190_v0  ;;  %v2395_v1 = vld [vmem:[%s3481_s2] ss:$0 sm:$0xff]  ;;  %v3031_v12 = vld [vmem:[#allocation2 + $0x178] sm:$0xff]   ;;  %v3032_v15 = vld [vmem:[#allocation2 + $0x130] sm:$0xff]  }
  0x2f   : > { %2611 = vmatprep.subr.bf16.mxu0 %v2996_v16  ;;  %v3033_v16 = vld [vmem:[#allocation2 + $0xf0] sm:$0xff]   ;;  %v3039_v23 = vld [vmem:[#allocation2 + $0xe0] sm:$0xff]   ;;  %v3041_v25 = vld [vmem:[#allocation2 + $0x118] sm:$0xff]  }
  0x30   : > { %v3042_v26 = vld [vmem:[#allocation2 + $0xd8] sm:$0xff]  }
  0x31   : > { %2829 = vmatpush3.bf16.msra.mxu1 %v2997_v17  ;;  %v3034_v17 = vld [vmem:[#allocation2 + $0x170] sm:$0xff]  }
  0x32   : > { %2612 = vmatpush3.bf16.msra.mxu0 %v2998_v18  ;;  %2830 = vmatprep.subr.bf16.mxu1 %v3190_v0  ;;  %v3035_v18 = vld [vmem:[#allocation2 + $0x128] sm:$0xff]  }
  0x33   : > { %2613 = vmatprep.subr.bf16.mxu0 %v2999_v19  ;;  %v3036_v19 = vld [vmem:[#allocation2 + $0xe8] sm:$0xff]  }
  0x35   : > { %2831 = vmatpush3.bf16.msra.mxu1 %v3000_v20  ;;  %v3037_v20 = vld [vmem:[#allocation2 + $0x168] sm:$0xff]  }
  0x36   : > { %2614 = vmatpush3.bf16.msra.mxu0 %v3001_v21  ;;  %2832 = vmatprep.subr.bf16.mxu1 %v3190_v0  ;;  %v3038_v21 = vld [vmem:[#allocation2 + $0x120] sm:$0xff]  }
  0x37   : > { %2615 = vmatprep.subr.bf16.mxu0 %v3002_v24  ;;  %v3040_v24 = vld [vmem:[#allocation2 + $0x160] sm:$0xff]  }
  0x39   : > { %2833 = vmatpush3.bf16.msra.mxu1 %v3003_v27  ;;  %v3043_v27 = vld [vmem:[#allocation2 + $0x158] sm:$0xff]  }
  0x3a   : > { %2616 = vmatpush3.bf16.msra.mxu0 %v3004_v29  ;;  %2838 = vmatprep.subr.bf16.mxu1 %v3190_v0  ;;  %v3045_v29 = vld [vmem:[#allocation2 + $0xd0] sm:$0xff]  }
  0x3b   : > { %2632 = vmatprep.subr.bf16.mxu0 %v3005_v30  ;;  %v3046_v30 = vld [vmem:[#allocation2 + $0x150] sm:$0xff]  }
  0x3c   : > { %2835 = vmatmul.mubr.msk.bf16.vlgmr.msra.gmra.mxu1 %vm3331_vm3, %v2393_v31  ;;  %v3047_v31 = vld [vmem:[#allocation2 + $0x108] sm:$0xff]  }
  0x3d   : > { %2391 = vmatmul.mubr.msk.bf16.vlgmr.msra.gmra.mxu0 %vm3346_vm5, %v2390_v33  ;;  %2839 = vmatpush3.bf16.msra.mxu1 %v3007_v34  ;;  %v3048_v33 = vld [vmem:[#allocation2 + $0xc8] sm:$0xff]  }
  0x3e   : > { %2633 = vmatpush3.bf16.msra.mxu0 %v3006_v35  ;;  %2840 = vmatprep.subr.bf16.mxu1 %v3190_v0  ;;  %v3049_v34 = vld [vmem:[#allocation2 + $0x148] sm:$0xff]   ;;  %v3050_v35 = vld [vmem:[#allocation2 + $0x100] sm:$0xff]  }
  0x3f   : > { %2634 = vmatprep.subr.bf16.mxu0 %v3008_v36  ;;  %2854 = vmatprep.mubr.msk.bf16.mxu1 %vm3191_vm0, %v3190_v0  ;;  %v3051_v36 = vld [vmem:[#allocation2 + $0xc0] sm:$0xff]  }
  0x41   : > { %2841 = vmatpush3.bf16.msra.mxu1 %v3010_v38  ;;  %v3053_v38 = vld [vmem:[#allocation2 + $0x1f8] sm:$0xff]  }
  0x42   : > { %2635 = vmatpush3.bf16.msra.mxu0 %v3009_v37  ;;  %2842 = vmatprep.subr.bf16.mxu1 %v3190_v0  ;;  %v3052_v37 = vld [vmem:[#allocation2 + $0x140] sm:$0xff]  }
  0x43   : > { %2636 = vmatprep.subr.bf16.mxu0 %v3011_v39 }
  0x45   : > { %2843 = vmatpush3.bf16.msra.mxu1 %v3013_v40 }
  0x46   : > { %2637 = vmatpush3.bf16.msra.mxu0 %v3012_v41  ;;  %2844 = vmatprep.subr.bf16.mxu1 %v3190_v0 }
  0x47   : > { %2638 = vmatprep.subr.bf16.mxu0 %v3014_v42 }
  0x49   : > { %2845 = vmatpush3.bf16.msra.mxu1 %v3016_v43 }
  0x4a   : > { %2639 = vmatpush3.bf16.msra.mxu0 %v3015_v44  ;;  %2846 = vmatprep.subr.bf16.mxu1 %v3190_v0  ;;  %v2428_v44 = vld [vmem:[%s3483_s4] ss:$0 sm:$0xff] }
  0x4b   : > { %2640 = vmatprep.subr.bf16.mxu0 %v3017_v45 }
  0x4d   : > { %2847 = vmatpush3.bf16.msra.mxu1 %v3019_v47 }
  0x4e   : > { %2641 = vmatpush3.bf16.msra.mxu0 %v3018_v46  ;;  %2848 = vmatprep.subr.bf16.mxu1 %v3190_v0 }
  0x4f   : > { %2642 = vmatprep.subr.bf16.mxu0 %v3020_v48 }
  0x51   : > { %2849 = vmatpush3.bf16.msra.mxu1 %v3022_v50 }
  0x52   : > { %2643 = vmatpush3.bf16.msra.mxu0 %v3021_v49  ;;  %2850 = vmatprep.subr.bf16.mxu1 %v3190_v0 }
  0x53   : > { %2644 = vmatprep.subr.bf16.mxu0 %v3023_v51 }
  0x55   : > { %2851 = vmatpush3.bf16.msra.mxu1 %v3025_v53 }
  0x56   : > { %2645 = vmatpush3.bf16.msra.mxu0 %v3024_v52  ;;  %2852 = vmatprep.subr.bf16.mxu1 %v3190_v0 }
  0x57   : > { %2646 = vmatprep.subr.bf16.mxu0 %v3026_v54 }
  0x59   : > { %2853 = vmatpush3.bf16.msra.mxu1 %v3028_v56  ;;  %v3055_v56 = vld [vmem:[#allocation2 + $0x238] sm:$0xff]  }
  0x5a   : > { %2647 = vmatpush3.bf16.msra.mxu0 %v3027_v55  ;;  %2858 = vmatprep.subr.bf16.mxu1 %v3190_v0  ;;  %v3054_v55 = vld [vmem:[#allocation2 + $0x1b8] sm:$0xff]  }
  0x5b   : > { %2663 = vmatprep.subr.bf16.mxu0 %v3029_v57 }
  0xfc   : > { %v516_v58 = vpop.f32.mrf.mxu1 }
  0xfd   : > { %v2617_v59 = vpop.f32.mrf.mxu0 }
  0xfe   : > { %v2836_v60 = vpop.f32.mrf.mxu1 }
  0xff   : > { %v2618_v61 = vpop.f32.mrf.mxu0  ;;  %v3057_v60 = vld [vmem:[#allocation2 + $0x1b0] sm:$0xff]  }
 0x100   : > { %v2619_v62 = vadd.f32 %v2618_v61, %v2617_v59  ;;  %v519_v63 = vpop.f32.mrf.mxu1  ;;  %v3056_v59 = vld [vmem:[#allocation2 + $0x1f0] sm:$0xff]  }
 0x101   : > { %v2620_v2 = vpop.f32.mrf.mxu0  ;;  %v3058_v61 = vld [vmem:[#allocation2 + $0x230] sm:$0xff]   ;;  %v3060_v63 = vld [vmem:[#allocation2 + $0x1a8] sm:$0xff]  }
 0x102   : > { %v517_v3 = vadd.f32 %v2619_v62, %v516_v58  ;;  %v2837_v4 = vpop.f32.mrf.mxu1  ;;  %v3059_v62 = vld [vmem:[#allocation2 + $0x1e8] sm:$0xff]   ;;  %v3062_v2 = vld [vmem:[#allocation2 + $0x1e0] sm:$0xff]  }
 0x103   : > { %v2621_v5 = vpop.f32.mrf.mxu0  ;;  %v3064_v4 = vld [vmem:[#allocation2 + $0x220] sm:$0xff]  }
 0x104   : > { %v3368_v6 = vadd.f32 %v2395_v1, %v517_v3  ;;  %v3061_v1 = vld [vmem:[#allocation2 + $0x228] sm:$0xff]   ;;  %v3063_v3 = vld [vmem:[#allocation2 + $0x1a0] sm:$0xff]   ;;  %v3065_v5 = vld [vmem:[#allocation2 + $0x1d8] sm:$0xff]  }
 0x106   : > { %v529_v7 = vmax.f32 %v3368_v6, 0.0 }
 0x108   : > { %v580_v8 = vrot.slane %v529_v7, 7  ;;  %v583_v9 = vrot.slane %v529_v7, 1  ;;  %v587_v10 = vpack.c.bf16 %v529_v7, %v529_v7  ;;  %v3066_v7 = vld [vmem:[#allocation2 + $0x198] sm:$0xff]  }
 0x10a   : > { %v2423_v13 = vpack.c.bf16 %v580_v8, %v580_v8  ;;  %v2426_v14 = vpack.c.bf16 %v583_v9, %v583_v9  ;;  %765 = vmatprep.mubr.bf16.mxu0 %v587_v10  ;;  %v3067_v8 = vld [vmem:[#allocation2 + $0x218] sm:$0xff]   ;;  %v3068_v9 = vld [vmem:[#allocation2 + $0x1d0] sm:$0xff]  }
 0x10b   : > { %v3069_v10 = vld [vmem:[#allocation2 + $0x190] sm:$0xff]  }
 0x10c   : > { %2424 = vmatmul.mubr.msk.bf16.vlgmr.msra.gmra.mxu0 %vm3346_vm5, %v2423_v13  ;;  %2855 = vmatmul.mubr.msk.bf16.vlgmr.msra.gmra.mxu1 %vm3331_vm3, %v2426_v14  ;;  %v3072_v13 = vld [vmem:[#allocation2 + $0x188] sm:$0xff]  }
 0x10d   : > { %2664 = vmatpush3.bf16.msra.mxu0 %v3030_v11  ;;  %2859 = vmatpush3.bf16.msra.mxu1 %v3031_v12  ;;  %v3070_v11 = vld [vmem:[#allocation2 + $0x210] sm:$0xff]   ;;  %v3071_v12 = vld [vmem:[#allocation2 + $0x1c8] sm:$0xff]  }
 0x10e   : > { %2665 = vmatprep.subr.bf16.mxu0 %v3032_v15  ;;  %2860 = vmatprep.subr.bf16.mxu1 %v3190_v0  ;;  %v3073_v14 = vld [vmem:[#allocation2 + $0x208] sm:$0xff]   ;;  %v3074_v15 = vld [vmem:[#allocation2 + $0x1c0] sm:$0xff]  }
 0x10f   : > { %2874 = vmatprep.mubr.msk.bf16.mxu1 %vm3191_vm0, %v3190_v0 }
 0x111   : > { %2666 = vmatpush3.bf16.msra.mxu0 %v3033_v16  ;;  %2861 = vmatpush3.bf16.msra.mxu1 %v3034_v17  ;;  %v3075_v16 = vld [vmem:[#allocation2 + $0x180] sm:$0xff]  }
 0x112   : > { %2667 = vmatprep.subr.bf16.mxu0 %v3035_v18  ;;  %2862 = vmatprep.subr.bf16.mxu1 %v3190_v0  ;;  %v3076_v17 = vld [vmem:[#allocation2 + $0x200] sm:$0xff]   ;;  %v3077_v18 = vld [vmem:[#allocation2 + $0x2b8] sm:$0xff]  }
 0x115   : > { %2668 = vmatpush3.bf16.msra.mxu0 %v3036_v19  ;;  %2863 = vmatpush3.bf16.msra.mxu1 %v3037_v20 }
 0x116   : > { %2669 = vmatprep.subr.bf16.mxu0 %v3038_v21  ;;  %2864 = vmatprep.subr.bf16.mxu1 %v3190_v0 }
 0x119   : > { %2670 = vmatpush3.bf16.msra.mxu0 %v3039_v23  ;;  %2865 = vmatpush3.bf16.msra.mxu1 %v3040_v24 }
 0x11a   : > { %2671 = vmatprep.subr.bf16.mxu0 %v3041_v25  ;;  %2866 = vmatprep.subr.bf16.mxu1 %v3190_v0  ;;  %v2462_v25 = vld [vmem:[%s3483_s4 + $0x1] ss:$0 sm:$0xff] }
 0x11d   : > { %2672 = vmatpush3.bf16.msra.mxu0 %v3042_v26  ;;  %2867 = vmatpush3.bf16.msra.mxu1 %v3043_v27 }
 0x11e   : > { %2868 = vmatprep.subr.bf16.mxu1 %v3190_v0  ;;  %2673 = vmatprep.subr.bf16.mxu0 %v3044_v28 }
 0x121   : > { %2674 = vmatpush3.bf16.msra.mxu0 %v3045_v29  ;;  %2869 = vmatpush3.bf16.msra.mxu1 %v3046_v30 }
 0x122   : > { %2870 = vmatprep.subr.bf16.mxu1 %v3190_v0  ;;  %2675 = vmatprep.subr.bf16.mxu0 %v3047_v31 }
 0x125   : > { %2676 = vmatpush3.bf16.msra.mxu0 %v3048_v33  ;;  %2871 = vmatpush3.bf16.msra.mxu1 %v3049_v34 }
 0x126   : > { %2872 = vmatprep.subr.bf16.mxu1 %v3190_v0  ;;  %2677 = vmatprep.subr.bf16.mxu0 %v3050_v35 }
 0x129   : > { %2678 = vmatpush3.bf16.msra.mxu0 %v3051_v36  ;;  %2873 = vmatpush3.bf16.msra.mxu1 %v3052_v37 }
 0x12a   : > { %2878 = vmatprep.subr.bf16.mxu1 %v3190_v0  ;;  %2694 = vmatprep.subr.bf16.mxu0 %v3053_v38  ;;  %v3078_v38 = vld [vmem:[#allocation2 + $0x278] sm:$0xff]  }
 0x1cc   : > { %v2648_v39 = vpop.f32.mrf.mxu0  ;;  %v807_v40 = vpop.f32.mrf.mxu1 }
 0x1ce   : > { %v2649_v41 = vpop.f32.mrf.mxu0  ;;  %v2856_v42 = vpop.f32.mrf.mxu1 }
 0x1cf   : > { %v2650_v43 = vadd.f32 %v2649_v41, %v2648_v39  ;;  %v3079_v39 = vld [vmem:[#allocation2 + $0x2f8] sm:$0xff]   ;;  %v3080_v42 = vld [vmem:[#allocation2 + $0x2b0] sm:$0xff]  }
 0x1d0   : > { %v2651_v45 = vpop.f32.mrf.mxu0  ;;  %v810_v46 = vpop.f32.mrf.mxu1 }
 0x1d1   : > { %v808_v47 = vadd.f32 %v2650_v43, %v807_v40  ;;  %v3082_v43 = vld [vmem:[#allocation2 + $0x2f0] sm:$0xff]   ;;  %v3084_v45 = vld [vmem:[#allocation2 + $0x268] sm:$0xff]  }
 0x1d2   : > { %v2652_v48 = vpop.f32.mrf.mxu0  ;;  %v2857_v49 = vpop.f32.mrf.mxu1  ;;  %v3085_v46 = vld [vmem:[#allocation2 + $0x2e8] sm:$0xff]  }
 0x1d3   : > { %v819_v50 = vadd.f32 %v2428_v44, %v808_v47  ;;  %v3083_v44 = vld [vmem:[#allocation2 + $0x2a8] sm:$0xff]   ;;  %v3086_v47 = vld [vmem:[#allocation2 + $0x2a0] sm:$0xff]  }
 0x1d4   : > { %v3087_v48 = vld [vmem:[#allocation2 + $0x260] sm:$0xff]  }
 0x1d5   : > { %v820_v51 = vmax.f32 %v819_v50, 0.0  ;;  %v3088_v49 = vld [vmem:[#allocation2 + $0x2e0] sm:$0xff]   ;;  %v3089_v50 = vld [vmem:[#allocation2 + $0x298] sm:$0xff]  }
 0x1d7   : > { %v873_v52 = vrot.slane %v820_v51, 7  ;;  %v876_v53 = vrot.slane %v820_v51, 1  ;;  %v880_v54 = vpack.c.bf16 %v820_v51, %v820_v51  ;;  %v3090_v51 = vld [vmem:[#allocation2 + $0x258] sm:$0xff]  }
 0x1d9   : > { %v2457_v57 = vpack.c.bf16 %v873_v52, %v873_v52  ;;  %v2460_v58 = vpack.c.bf16 %v876_v53, %v876_v53  ;;  %1058 = vmatprep.mubr.bf16.mxu0 %v880_v54  ;;  %v3091_v52 = vld [vmem:[#allocation2 + $0x2d8] sm:$0xff]   ;;  %v3092_v53 = vld [vmem:[#allocation2 + $0x290] sm:$0xff]  }
 0x1da   : > { %v3093_v54 = vld [vmem:[#allocation2 + $0x250] sm:$0xff]  }
 0x1db   : > { %2458 = vmatmul.mubr.msk.bf16.vlgmr.msra.gmra.mxu0 %vm3346_vm5, %v2457_v57  ;;  %2875 = vmatmul.mubr.msk.bf16.vlgmr.msra.gmra.mxu1 %vm3331_vm3, %v2460_v58  ;;  %v3096_v57 = vld [vmem:[#allocation2 + $0x248] sm:$0xff]  }
 0x1dc   : > { %2695 = vmatpush3.bf16.msra.mxu0 %v3054_v55  ;;  %2879 = vmatpush3.bf16.msra.mxu1 %v3055_v56  ;;  %v3094_v55 = vld [vmem:[#allocation2 + $0x2d0] sm:$0xff]   ;;  %v3095_v56 = vld [vmem:[#allocation2 + $0x288] sm:$0xff]  }
 0x1dd   : > { %2696 = vmatprep.subr.bf16.mxu0 %v3056_v59  ;;  %2880 = vmatprep.subr.bf16.mxu1 %v3190_v0  ;;  %v3097_v58 = vld [vmem:[#allocation2 + $0x2c8] sm:$0xff]   ;;  %v3098_v59 = vld [vmem:[#allocation2 + $0x280] sm:$0xff]  }
 0x1de   : > { %2894 = vmatprep.mubr.msk.bf16.mxu1 %vm3191_vm0, %v3190_v0 }
 0x1e0   : > { %2697 = vmatpush3.bf16.msra.mxu0 %v3057_v60  ;;  %2881 = vmatpush3.bf16.msra.mxu1 %v3058_v61  ;;  %v3099_v60 = vld [vmem:[#allocation2 + $0x240] sm:$0xff]  }
 0x1e1   : > { %2698 = vmatprep.subr.bf16.mxu0 %v3059_v62  ;;  %2882 = vmatprep.subr.bf16.mxu1 %v3190_v0  ;;  %v3100_v61 = vld [vmem:[#allocation2 + $0x2c0] sm:$0xff]   ;;  %v3101_v62 = vld [vmem:[#allocation2 + $0x378] sm:$0xff]  }
 0x1e4   : > { %2699 = vmatpush3.bf16.msra.mxu0 %v3060_v63  ;;  %2883 = vmatpush3.bf16.msra.mxu1 %v3061_v1 }
 0x1e5   : > { %2700 = vmatprep.subr.bf16.mxu0 %v3062_v2  ;;  %2884 = vmatprep.subr.bf16.mxu1 %v3190_v0 }
 0x1e8   : > { %2701 = vmatpush3.bf16.msra.mxu0 %v3063_v3  ;;  %2885 = vmatpush3.bf16.msra.mxu1 %v3064_v4 }
 0x1e9   : > { %2886 = vmatprep.subr.bf16.mxu1 %v3190_v0  ;;  %2702 = vmatprep.subr.bf16.mxu0 %v3065_v5  ;;  %v2496_v5 = vld [vmem:[%s3483_s4 + $0x2] ss:$0 sm:$0xff] }
 0x1ec   : > { %2703 = vmatpush3.bf16.msra.mxu0 %v3066_v7  ;;  %2887 = vmatpush3.bf16.msra.mxu1 %v3067_v8 }
 0x1ed   : > { %2888 = vmatprep.subr.bf16.mxu1 %v3190_v0  ;;  %2704 = vmatprep.subr.bf16.mxu0 %v3068_v9 }
 0x1f0   : > { %2705 = vmatpush3.bf16.msra.mxu0 %v3069_v10  ;;  %2889 = vmatpush3.bf16.msra.mxu1 %v3070_v11 }
 0x1f1   : > { %2890 = vmatprep.subr.bf16.mxu1 %v3190_v0  ;;  %2706 = vmatprep.subr.bf16.mxu0 %v3071_v12 }
 0x1f4   : > { %2707 = vmatpush3.bf16.msra.mxu0 %v3072_v13  ;;  %2891 = vmatpush3.bf16.msra.mxu1 %v3073_v14 }
 0x1f5   : > { %2708 = vmatprep.subr.bf16.mxu0 %v3074_v15  ;;  %2892 = vmatprep.subr.bf16.mxu1 %v3190_v0 }
 0x1f8   : > { %2709 = vmatpush3.bf16.msra.mxu0 %v3075_v16  ;;  %2893 = vmatpush3.bf16.msra.mxu1 %v3076_v17  ;;  %v3102_v17 = vld [vmem:[#allocation2 + $0x338] sm:$0xff]  }
 0x1f9   : > { %2898 = vmatprep.subr.bf16.mxu1 %v3190_v0  ;;  %2725 = vmatprep.subr.bf16.mxu0 %v3077_v18  ;;  %v3103_v18 = vld [vmem:[#allocation2 + $0x3b8] sm:$0xff]  }
 0x29b   : > { %v2679_v19 = vpop.f32.mrf.mxu0  ;;  %v1100_v20 = vpop.f32.mrf.mxu1 }
 0x29d   : > { %v2680_v21 = vpop.f32.mrf.mxu0  ;;  %v2876_v23 = vpop.f32.mrf.mxu1 }
 0x29e   : > { %v2681_v24 = vadd.f32 %v2680_v21, %v2679_v19  ;;  %v3104_v21 = vld [vmem:[#allocation2 + $0x370] sm:$0xff]  }
 0x29f   : > { %v2682_v26 = vpop.f32.mrf.mxu0  ;;  %v1103_v27 = vpop.f32.mrf.mxu1  ;;  %v3105_v23 = vld [vmem:[#allocation2 + $0x330] sm:$0xff]  }
 0x2a0   : > { %v1101_v28 = vadd.f32 %v2681_v24, %v1100_v20  ;;  %v3106_v24 = vld [vmem:[#allocation2 + $0x3b0] sm:$0xff]   ;;  %v3108_v26 = vld [vmem:[#allocation2 + $0x328] sm:$0xff]  }
 0x2a1   : > { %v2683_v29 = vpop.f32.mrf.mxu0  ;;  %v2877_v30 = vpop.f32.mrf.mxu1  ;;  %v3109_v27 = vld [vmem:[#allocation2 + $0x3a8] sm:$0xff]  }
 0x2a2   : > { %v1112_v31 = vadd.f32 %v2462_v25, %v1101_v28  ;;  %v3107_v25 = vld [vmem:[#allocation2 + $0x368] sm:$0xff]   ;;  %v3110_v28 = vld [vmem:[#allocation2 + $0x360] sm:$0xff]  }
 0x2a3   : > { %v3111_v29 = vld [vmem:[#allocation2 + $0x320] sm:$0xff]  }
 0x2a4   : > { %v3406_v33 = vadd.f32 %v1112_v31, %v3368_v6  ;;  %v3081_v6 = vld [vmem:[#allocation2 + $0x270] sm:$0xff]   ;;  %v3112_v30 = vld [vmem:[#allocation2 + $0x3a0] sm:$0xff]   ;;  %v3113_v31 = vld [vmem:[#allocation2 + $0x358] sm:$0xff]  }
 0x2a6   : > { %v1114_v34 = vmax.f32 %v3406_v33, 0.0 }
 0x2a8   : > { %v1174_v35 = vpack.c.bf16 %v1114_v34, %v1114_v34  ;;  %v1167_v36 = vrot.slane %v1114_v34, 7  ;;  %v1170_v37 = vrot.slane %v1114_v34, 1  ;;  %v3114_v34 = vld [vmem:[#allocation2 + $0x318] sm:$0xff]  }
 0x2aa   : > { %1352 = vmatprep.mubr.bf16.mxu0 %v1174_v35  ;;  %v2491_v40 = vpack.c.bf16 %v1167_v36, %v1167_v36  ;;  %v2494_v41 = vpack.c.bf16 %v1170_v37, %v1170_v37  ;;  %v3115_v35 = vld [vmem:[#allocation2 + $0x398] sm:$0xff]   ;;  %v3116_v36 = vld [vmem:[#allocation2 + $0x350] sm:$0xff]  }
 0x2ab   : > { %v3117_v37 = vld [vmem:[#allocation2 + $0x310] sm:$0xff]  }
 0x2ac   : > { %2492 = vmatmul.mubr.msk.bf16.vlgmr.msra.gmra.mxu0 %vm3346_vm5, %v2491_v40  ;;  %2895 = vmatmul.mubr.msk.bf16.vlgmr.msra.gmra.mxu1 %vm3331_vm3, %v2494_v41  ;;  %v3120_v40 = vld [vmem:[#allocation2 + $0x308] sm:$0xff]  }
 0x2ad   : > { %2726 = vmatpush3.bf16.msra.mxu0 %v3078_v38  ;;  %2899 = vmatpush3.bf16.msra.mxu1 %v3079_v39  ;;  %v3118_v38 = vld [vmem:[#allocation2 + $0x390] sm:$0xff]   ;;  %v3119_v39 = vld [vmem:[#allocation2 + $0x348] sm:$0xff]  }
 0x2ae   : > { %2727 = vmatprep.subr.bf16.mxu0 %v3080_v42  ;;  %2900 = vmatprep.subr.bf16.mxu1 %v3190_v0  ;;  %v3121_v41 = vld [vmem:[#allocation2 + $0x388] sm:$0xff]   ;;  %v3122_v42 = vld [vmem:[#allocation2 + $0x340] sm:$0xff]  }
 0x2af   : > { %2914 = vmatprep.mubr.msk.bf16.mxu1 %vm3191_vm0, %v3190_v0 }
 0x2b1   : > { %2728 = vmatpush3.bf16.msra.mxu0 %v3081_v6  ;;  %2901 = vmatpush3.bf16.msra.mxu1 %v3082_v43  ;;  %v3123_v6 = vld [vmem:[#allocation2 + $0x300] sm:$0xff]  }
 0x2b2   : > { %2729 = vmatprep.subr.bf16.mxu0 %v3083_v44  ;;  %2902 = vmatprep.subr.bf16.mxu1 %v3190_v0  ;;  %v3124_v43 = vld [vmem:[#allocation2 + $0x380] sm:$0xff]   ;;  %v3125_v44 = vld [vmem:[#allocation2 + $0x438] sm:$0xff]  }
 0x2b5   : > { %2730 = vmatpush3.bf16.msra.mxu0 %v3084_v45  ;;  %2903 = vmatpush3.bf16.msra.mxu1 %v3085_v46 }
 0x2b6   : > { %2731 = vmatprep.subr.bf16.mxu0 %v3086_v47  ;;  %2904 = vmatprep.subr.bf16.mxu1 %v3190_v0 }
 0x2b9   : > { %2732 = vmatpush3.bf16.msra.mxu0 %v3087_v48  ;;  %2905 = vmatpush3.bf16.msra.mxu1 %v3088_v49 }
 0x2ba   : > { %2733 = vmatprep.subr.bf16.mxu0 %v3089_v50  ;;  %2906 = vmatprep.subr.bf16.mxu1 %v3190_v0  ;;  %v2530_v50 = vld [vmem:[%s3483_s4 + $0x3] ss:$0 sm:$0xff] }
 0x2bd   : > { %2734 = vmatpush3.bf16.msra.mxu0 %v3090_v51  ;;  %2907 = vmatpush3.bf16.msra.mxu1 %v3091_v52 }
 0x2be   : > { %2908 = vmatprep.subr.bf16.mxu1 %v3190_v0  ;;  %2735 = vmatprep.subr.bf16.mxu0 %v3092_v53 }
 0x2c1   : > { %2736 = vmatpush3.bf16.msra.mxu0 %v3093_v54  ;;  %2909 = vmatpush3.bf16.msra.mxu1 %v3094_v55 }
 0x2c2   : > { %2910 = vmatprep.subr.bf16.mxu1 %v3190_v0  ;;  %2737 = vmatprep.subr.bf16.mxu0 %v3095_v56 }
 0x2c5   : > { %2738 = vmatpush3.bf16.msra.mxu0 %v3096_v57  ;;  %2911 = vmatpush3.bf16.msra.mxu1 %v3097_v58 }
 0x2c6   : > { %2912 = vmatprep.subr.bf16.mxu1 %v3190_v0  ;;  %2739 = vmatprep.subr.bf16.mxu0 %v3098_v59 }
 0x2c9   : > { %2740 = vmatpush3.bf16.msra.mxu0 %v3099_v60  ;;  %2913 = vmatpush3.bf16.msra.mxu1 %v3100_v61 }
 0x2ca   : > { %2918 = vmatprep.subr.bf16.mxu1 %v3190_v0  ;;  %2756 = vmatprep.subr.bf16.mxu0 %v3101_v62  ;;  %v3126_v62 = vld [vmem:[#allocation2 + $0x3f8] sm:$0xff]  }
 0x36c   : > { %v2710_v63 = vpop.f32.mrf.mxu0  ;;  %v1394_v1 = vpop.f32.mrf.mxu1 }
 0x36e   : > { %v2711_v2 = vpop.f32.mrf.mxu0  ;;  %v2896_v3 = vpop.f32.mrf.mxu1 }
 0x36f   : > { %v2712_v4 = vadd.f32 %v2711_v2, %v2710_v63  ;;  %v3127_v63 = vld [vmem:[#allocation2 + $0x478] sm:$0xff]   ;;  %v3128_v3 = vld [vmem:[#allocation2 + $0x430] sm:$0xff]  }
 0x370   : > { %v2713_v7 = vpop.f32.mrf.mxu0  ;;  %v1397_v8 = vpop.f32.mrf.mxu1 }
 0x371   : > { %v1395_v9 = vadd.f32 %v2712_v4, %v1394_v1  ;;  %v3130_v4 = vld [vmem:[#allocation2 + $0x470] sm:$0xff]   ;;  %v3132_v7 = vld [vmem:[#allocation2 + $0x3e8] sm:$0xff]  }
 0x372   : > { %v2714_v10 = vpop.f32.mrf.mxu0  ;;  %v2897_v11 = vpop.f32.mrf.mxu1  ;;  %v3133_v8 = vld [vmem:[#allocation2 + $0x468] sm:$0xff]  }
 0x373   : > { %v1406_v12 = vadd.f32 %v2496_v5, %v1395_v9  ;;  %v3131_v5 = vld [vmem:[#allocation2 + $0x428] sm:$0xff]   ;;  %v3134_v9 = vld [vmem:[#allocation2 + $0x420] sm:$0xff]  }
 0x374   : > { %v3135_v10 = vld [vmem:[#allocation2 + $0x3e0] sm:$0xff]  }
 0x375   : > { %v1407_v13 = vmax.f32 %v1406_v12, 0.0  ;;  %v3136_v11 = vld [vmem:[#allocation2 + $0x460] sm:$0xff]   ;;  %v3137_v12 = vld [vmem:[#allocation2 + $0x418] sm:$0xff]  }
 0x377   : > { %v1460_v14 = vrot.slane %v1407_v13, 7  ;;  %v1463_v15 = vrot.slane %v1407_v13, 1  ;;  %v1467_v16 = vpack.c.bf16 %v1407_v13, %v1407_v13  ;;  %v3138_v13 = vld [vmem:[#allocation2 + $0x3d8] sm:$0xff]  }
 0x379   : > { %v2525_v19 = vpack.c.bf16 %v1460_v14, %v1460_v14  ;;  %v2528_v20 = vpack.c.bf16 %v1463_v15, %v1463_v15  ;;  %1645 = vmatprep.mubr.bf16.mxu0 %v1467_v16  ;;  %v3139_v14 = vld [vmem:[#allocation2 + $0x458] sm:$0xff]   ;;  %v3140_v15 = vld [vmem:[#allocation2 + $0x410] sm:$0xff]  }
 0x37a   : > { %v3141_v16 = vld [vmem:[#allocation2 + $0x3d0] sm:$0xff]  }
 0x37b   : > { %2526 = vmatmul.mubr.msk.bf16.vlgmr.msra.gmra.mxu0 %vm3346_vm5, %v2525_v19  ;;  %2915 = vmatmul.mubr.msk.bf16.vlgmr.msra.gmra.mxu1 %vm3331_vm3, %v2528_v20  ;;  %v3144_v19 = vld [vmem:[#allocation2 + $0x3c8] sm:$0xff]  }
 0x37c   : > { %2757 = vmatpush3.bf16.msra.mxu0 %v3102_v17  ;;  %2919 = vmatpush3.bf16.msra.mxu1 %v3103_v18  ;;  %v3142_v17 = vld [vmem:[#allocation2 + $0x450] sm:$0xff]   ;;  %v3143_v18 = vld [vmem:[#allocation2 + $0x408] sm:$0xff]  }
 0x37d   : > { %2758 = vmatprep.subr.bf16.mxu0 %v3104_v21  ;;  %2920 = vmatprep.subr.bf16.mxu1 %v3190_v0  ;;  %v3145_v20 = vld [vmem:[#allocation2 + $0x448] sm:$0xff]   ;;  %v3146_v21 = vld [vmem:[#allocation2 + $0x400] sm:$0xff]  }
 0x37e   : > { %2934 = vmatprep.mubr.msk.bf16.mxu1 %vm3191_vm0, %v3190_v0 }
 0x380   : > { %2759 = vmatpush3.bf16.msra.mxu0 %v3105_v23  ;;  %2921 = vmatpush3.bf16.msra.mxu1 %v3106_v24  ;;  %v3147_v23 = vld [vmem:[#allocation2 + $0x3c0] sm:$0xff]  }
 0x381   : > { %2760 = vmatprep.subr.bf16.mxu0 %v3107_v25  ;;  %2922 = vmatprep.subr.bf16.mxu1 %v3190_v0  ;;  %v3148_v24 = vld [vmem:[#allocation2 + $0x440] sm:$0xff]  }
 0x384   : > { %2761 = vmatpush3.bf16.msra.mxu0 %v3108_v26  ;;  %2923 = vmatpush3.bf16.msra.mxu1 %v3109_v27 }
 0x385   : > { %2762 = vmatprep.subr.bf16.mxu0 %v3110_v28  ;;  %2924 = vmatprep.subr.bf16.mxu1 %v3190_v0 }
 0x388   : > { %2763 = vmatpush3.bf16.msra.mxu0 %v3111_v29  ;;  %2925 = vmatpush3.bf16.msra.mxu1 %v3112_v30  ;;  %v2564_v30 = vld [vmem:[%s3483_s4 + $0x4] ss:$0 sm:$0xff] }
 0x389   : > { %2926 = vmatprep.subr.bf16.mxu1 %v3190_v0  ;;  %2764 = vmatprep.subr.bf16.mxu0 %v3113_v31 }
 0x38c   : > { %2765 = vmatpush3.bf16.msra.mxu0 %v3114_v34  ;;  %2927 = vmatpush3.bf16.msra.mxu1 %v3115_v35 }
 0x38d   : > { %2928 = vmatprep.subr.bf16.mxu1 %v3190_v0  ;;  %2766 = vmatprep.subr.bf16.mxu0 %v3116_v36 }
 0x390   : > { %2767 = vmatpush3.bf16.msra.mxu0 %v3117_v37  ;;  %2929 = vmatpush3.bf16.msra.mxu1 %v3118_v38 }
 0x391   : > { %2930 = vmatprep.subr.bf16.mxu1 %v3190_v0  ;;  %2768 = vmatprep.subr.bf16.mxu0 %v3119_v39 }
 0x394   : > { %2769 = vmatpush3.bf16.msra.mxu0 %v3120_v40  ;;  %2931 = vmatpush3.bf16.msra.mxu1 %v3121_v41 }
 0x395   : > { %2770 = vmatprep.subr.bf16.mxu0 %v3122_v42  ;;  %2932 = vmatprep.subr.bf16.mxu1 %v3190_v0 }
 0x398   : > { %2771 = vmatpush3.bf16.msra.mxu0 %v3123_v6  ;;  %2933 = vmatpush3.bf16.msra.mxu1 %v3124_v43 }
 0x399   : > { %2938 = vmatprep.subr.bf16.mxu1 %v3190_v0  ;;  %2787 = vmatprep.subr.bf16.mxu0 %v3125_v44 }
 0x43b   : > { %v2741_v45 = vpop.f32.mrf.mxu0  ;;  %v1687_v46 = vpop.f32.mrf.mxu1 }
 0x43d   : > { %v2742_v47 = vpop.f32.mrf.mxu0  ;;  %v2916_v48 = vpop.f32.mrf.mxu1 }
 0x43e   : > { %v2743_v49 = vadd.f32 %v2742_v47, %v2741_v45  ;;  %v2598_v48 = vld [vmem:[%s3483_s4 + $0x5] ss:$0 sm:$0xff] }
 0x43f   : > { %v2744_v51 = vpop.f32.mrf.mxu0  ;;  %v1690_v52 = vpop.f32.mrf.mxu1 }
 0x440   : > { %v1688_v53 = vadd.f32 %v2743_v49, %v1687_v46 }
 0x441   : > { %v2745_v54 = vpop.f32.mrf.mxu0  ;;  %v2917_v55 = vpop.f32.mrf.mxu1 }
 0x442   : > { %v1699_v56 = vadd.f32 %v2530_v50, %v1688_v53 }
 0x444   : > { %v3444_v57 = vadd.f32 %v1699_v56, %v3406_v33  ;;  %v3129_v33 = vld [vmem:[#allocation2 + $0x3f0] sm:$0xff]  }
 0x446   : > { %v1701_v58 = vmax.f32 %v3444_v57, 0.0 }
 0x448   : > { %v1761_v59 = vpack.c.bf16 %v1701_v58, %v1701_v58  ;;  %v1754_v60 = vrot.slane %v1701_v58, 7  ;;  %v1757_v61 = vrot.slane %v1701_v58, 1 }
 0x44a   : > { %1939 = vmatprep.mubr.bf16.mxu0 %v1761_v59  ;;  %v2559_v1 = vpack.c.bf16 %v1754_v60, %v1754_v60  ;;  %v2562_v2 = vpack.c.bf16 %v1757_v61, %v1757_v61 }
 0x44c   : > { %2560 = vmatmul.mubr.msk.bf16.vlgmr.msra.gmra.mxu0 %vm3346_vm5, %v2559_v1  ;;  %2935 = vmatmul.mubr.msk.bf16.vlgmr.msra.gmra.mxu1 %vm3331_vm3, %v2562_v2 }
 0x44d   : > { %2788 = vmatpush3.bf16.msra.mxu0 %v3126_v62  ;;  %2939 = vmatpush3.bf16.msra.mxu1 %v3127_v63 }
 0x44e   : > { %2789 = vmatprep.subr.bf16.mxu0 %v3128_v3  ;;  %2940 = vmatprep.subr.bf16.mxu1 %v3190_v0 }
 0x44f   : > { %2954 = vmatprep.mubr.msk.bf16.mxu1 %vm3191_vm0, %v3190_v0 }
 0x451   : > { %2790 = vmatpush3.bf16.msra.mxu0 %v3129_v33  ;;  %2941 = vmatpush3.bf16.msra.mxu1 %v3130_v4 }
 0x452   : > { %2791 = vmatprep.subr.bf16.mxu0 %v3131_v5  ;;  %2942 = vmatprep.subr.bf16.mxu1 %v3190_v0 }
 0x455   : > { %2792 = vmatpush3.bf16.msra.mxu0 %v3132_v7  ;;  %2943 = vmatpush3.bf16.msra.mxu1 %v3133_v8 }
 0x456   : > { %2793 = vmatprep.subr.bf16.mxu0 %v3134_v9  ;;  %2944 = vmatprep.subr.bf16.mxu1 %v3190_v0 }
 0x459   : > { %2794 = vmatpush3.bf16.msra.mxu0 %v3135_v10  ;;  %2945 = vmatpush3.bf16.msra.mxu1 %v3136_v11 }
 0x45a   : > { %2795 = vmatprep.subr.bf16.mxu0 %v3137_v12  ;;  %2946 = vmatprep.subr.bf16.mxu1 %v3190_v0 }
 0x45d   : > { %2796 = vmatpush3.bf16.msra.mxu0 %v3138_v13  ;;  %2947 = vmatpush3.bf16.msra.mxu1 %v3139_v14 }
 0x45e   : > { %2948 = vmatprep.subr.bf16.mxu1 %v3190_v0  ;;  %2797 = vmatprep.subr.bf16.mxu0 %v3140_v15 }
 0x461   : > { %2798 = vmatpush3.bf16.msra.mxu0 %v3141_v16  ;;  %2949 = vmatpush3.bf16.msra.mxu1 %v3142_v17 }
 0x462   : > { %2950 = vmatprep.subr.bf16.mxu1 %v3190_v0  ;;  %2799 = vmatprep.subr.bf16.mxu0 %v3143_v18 }
 0x465   : > { %2800 = vmatpush3.bf16.msra.mxu0 %v3144_v19  ;;  %2951 = vmatpush3.bf16.msra.mxu1 %v3145_v20 }
 0x466   : > { %2952 = vmatprep.subr.bf16.mxu1 %v3190_v0  ;;  %2801 = vmatprep.subr.bf16.mxu0 %v3146_v21 }
 0x469   : > { %2802 = vmatpush3.bf16.msra.mxu0 %v3147_v23  ;;  %2953 = vmatpush3.bf16.msra.mxu1 %v3148_v24 }
 0x50c   : > { %v2772_v25 = vpop.f32.mrf.mxu0  ;;  %v1981_v26 = vpop.f32.mrf.mxu1 }
 0x50e   : > { %v2773_v27 = vpop.f32.mrf.mxu0  ;;  %v2936_v28 = vpop.f32.mrf.mxu1 }
 0x50f   : > { %v2774_v29 = vadd.f32 %v2773_v27, %v2772_v25 }
 0x510   : > { %v2775_v31 = vpop.f32.mrf.mxu0  ;;  %v1984_v34 = vpop.f32.mrf.mxu1 }
 0x511   : > { %v1982_v35 = vadd.f32 %v2774_v29, %v1981_v26 }
 0x512   : > { %v2776_v36 = vpop.f32.mrf.mxu0  ;;  %v2937_v37 = vpop.f32.mrf.mxu1 }
 0x513   : > { %v1993_v0 = vadd.f32 %v2564_v30, %v1982_v35 }
 0x515   : > { %v1994_v38 = vmax.f32 %v1993_v0, 0.0 }
 0x517   : > { %v2047_v39 = vrot.slane %v1994_v38, 7  ;;  %v2050_v40 = vrot.slane %v1994_v38, 1  ;;  %v2054_v41 = vpack.c.bf16 %v1994_v38, %v1994_v38 }
 0x519   : > { %v2593_v42 = vpack.c.bf16 %v2047_v39, %v2047_v39  ;;  %v2596_v6 = vpack.c.bf16 %v2050_v40, %v2050_v40  ;;  %2232 = vmatprep.mubr.bf16.mxu0 %v2054_v41 }
 0x51b   : > { %2594 = vmatmul.mubr.msk.bf16.vlgmr.msra.gmra.mxu0 %vm3346_vm5, %v2593_v42  ;;  %2955 = vmatmul.mubr.msk.bf16.vlgmr.msra.gmra.mxu1 %vm3331_vm3, %v2596_v6 }
 0x5db   : > { %v2803_v43 = vpop.f32.mrf.mxu0  ;;  %v2274_v44 = vpop.f32.mrf.mxu1 }
 0x5dd   : > { %v2804_v45 = vpop.f32.mrf.mxu0  ;;  %v2956_v46 = vpop.f32.mrf.mxu1 }
 0x5de   : > { %v2805_v47 = vadd.f32 %v2804_v45, %v2803_v43 }
 0x5df   : > { %v2806_v49 = vpop.f32.mrf.mxu0  ;;  %v2277_v50 = vpop.f32.mrf.mxu1 }
 0x5e0   : > { %v2275_v51 = vadd.f32 %v2805_v47, %v2274_v44 }
 0x5e1   : > { %v2807_v52 = vpop.f32.mrf.mxu0  ;;  %v2957_v53 = vpop.f32.mrf.mxu1 }
 0x5e2   : > { %v2286_v54 = vadd.f32 %v2598_v48, %v2275_v51 }
 0x5e4   : > { %v2287_v22 = vadd.f32 %v2286_v54, %v3444_v57 }
 0x5e6   : > { %2288 = vst [vmem:[%s234_s28] sm:$0xff] %v2287_v22 }
 0x5e7 PF: > { %s16_s18 = sadd.s32 1, %s3185_s18  }
 0x5e8   : > { %p13_p1 = scmp.ge.s32.totalorder %s16_s18, 4  }
 0x5ea   :  { %15 = sbr.rel (!%p13_p1) target bundleno = 1 (0x1), region = 85 }
 0x5ef   :  { %2308 = vsyncpa [#allocation3], 1 }
 0x5f0   :  { %2310 = vsyncpa [#allocation3 + $0x1], 1 }

</bundles_post_ra>
